<compile_context>
chip_gen: v7x
topology: tpu7x:2x2x1
jax: 0.10.0
libtpu: 0.0.40
codegen_flags: <defaults>
</compile_context>

<pallas_src>
import jax
import jax.numpy as jnp
import numpy as np
from jax import lax
from jax.experimental import pallas as pl
from jax.experimental.pallas import tpu as pltpu

KSIZE = 7           # SpatialAttention kernel_size
PAD = KSIZE // 2    # padding = 3


def build_spatial_toeplitz(wsp, H, W):
    """Turn the (2, 7*7) spatial conv weight into a single (2*HW, HW)
    Toeplitz operator T such that
        conv(avg, max)[p] = concat([avg, max], axis=-1) @ T
    (zero-padded 7x7 cross-correlation, 2 -> 1 channels).  Indices are static
    numpy; values come from the (possibly traced) weight via gather+scatter.

    TODO(synk): O(HW^2) operator -- for large spatial sizes (>~32x32 on v7x)
    block the contraction over an HW grid axis or switch to pltpu.roll-based
    shifted FMAs instead of materializing the full matrix in VMEM."""
    HW = H * W
    ph, pw = np.meshgrid(np.arange(H), np.arange(W), indexing="ij")
    ph = ph.ravel()
    pw = pw.ravel()                                   # output positions (HW,)
    c_l, q_l, p_l, t_l = [], [], [], []
    for c in range(2):
        for ki in range(KSIZE):
            for kj in range(KSIZE):
                qh = ph + ki - PAD
                qw = pw + kj - PAD
                valid = (qh >= 0) & (qh < H) & (qw >= 0) & (qw < W)
                p_idx = np.arange(HW)[valid]
                q_idx = qh[valid] * W + qw[valid]
                c_l.append(np.full(p_idx.shape, c, np.int32))
                q_l.append(q_idx.astype(np.int32))
                p_l.append(p_idx.astype(np.int32))
                t_l.append(np.full(p_idx.shape, ki * KSIZE + kj, np.int32))
    c_idx = np.concatenate(c_l)
    q_idx = np.concatenate(q_l)
    p_idx = np.concatenate(p_l)
    t_idx = np.concatenate(t_l)
    vals = wsp[c_idx, t_idx].astype(jnp.float32)      # gather weights per tap
    row_idx = c_idx * HW + q_idx                      # stack avg / max blocks
    T = jnp.zeros((2 * HW, HW), jnp.float32).at[row_idx, p_idx].add(vals)
    return T


def cbam_kernel(x_ref, w1_ref, b1_ref, w2t_ref, b2_ref, tsp_ref, bsp_ref,
                o_ref):
    # x_ref:   (Bb, C, HW)    VMEM bf16   lane-dense activation slab
    # w1_ref:  (hid, C)       VMEM f32    fc[0].weight (row-major, lane-dense)
    # b1_ref:  (hid,)         SMEM f32    fc[0].bias (scalar reads)
    # w2t_ref: (hid, C)       VMEM f32    fc[2].weight.T
    # b2_ref:  (1, C)         VMEM f32    fc[2].bias
    # tsp_ref: (2*HW, HW)     VMEM f32    fused spatial-conv Toeplitz operator
    # bsp_ref: (1, 1)         SMEM f32    spatial-conv bias (scalar)
    Bb, C, HW = x_ref.shape
    hid = w1_ref.shape[0]
    x = x_ref[...].astype(jnp.float32)                       # (Bb, C, HW) f32

    # ---------------- Channel attention ----------------
    # lane-axis reductions (adaptive avg / max pool to 1x1)
    avg_c = jnp.sum(x, axis=2) * jnp.float32(1.0 / HW)       # (Bb, C)
    max_c = jnp.max(x, axis=2)                               # (Bb, C)
    pooled = jnp.concatenate([avg_c, max_c], axis=0)         # (2*Bb, C)

    # Shared MLP on the VPU: hid = C // r is tiny, so MXU tiles would be
    # <2% utilized with an un-hidden result-FIFO pop.  Unrolled over hid:
    # layer1 = lane-reduce against each weight row, layer2 = broadcast FMA.
    fc = jnp.zeros((2 * Bb, C), jnp.float32) + b2_ref[...]   # start with bias
    for j in range(hid):
        hj = jnp.sum(pooled * w1_ref[pl.ds(j, 1), :], axis=1, keepdims=True)
        hj = jnp.maximum(hj + b1_ref[j], 0.0)                # (2*Bb, 1) ReLU
        fc = fc + hj * w2t_ref[pl.ds(j, 1), :]               # (2*Bb, C)
    ca = jax.nn.sigmoid(fc[:Bb, :] + fc[Bb:, :])             # (Bb, C)

    # x_ca is a single in-kernel value shared by both channel reductions and
    # the final store (no extra HBM round-trips).
    x_ca = x * ca[:, :, None]                                # (Bb, C, HW)

    # ---------------- Spatial attention ----------------
    avg_s = jnp.sum(x_ca, axis=1) * jnp.float32(1.0 / C)     # (Bb, HW)
    max_s = jnp.max(x_ca, axis=1)                            # (Bb, HW)
    pooled_s = jnp.concatenate([avg_s, max_s], axis=1)       # (Bb, 2*HW)

    # 7x7 zero-padded conv (2 -> 1 channel) as ONE fused MXU contraction.
    conv = (jnp.dot(pooled_s, tsp_ref[...],
                    preferred_element_type=jnp.float32)
            + bsp_ref[0, 0])                                 # (Bb, HW)
    sa = jax.nn.sigmoid(conv)

    o_ref[...] = (x_ca * sa[:, None, :]).astype(o_ref.dtype)


def _invariant_spec(shape):
    """Full-array, grid-invariant VMEM spec, single-buffered when supported."""
    idx_map = lambda b: (0,) * len(shape)
    try:
        return pl.BlockSpec(shape, idx_map, pipeline_mode=pl.Buffered(1))
    except TypeError:  # older jax without pipeline_mode: fall back (2 bufs)
        return pl.BlockSpec(shape, idx_map)


def cbam_prepare(w1, b1, w2, b2, wsp, bsp, H, W):
    """Weight layout plumbing + Toeplitz build.  Call once per weight update
    and reuse across forward passes (the Toeplitz scatter is the expensive
    part; rebuilding it per call would dominate HBM traffic)."""
    hid, C = w1.shape
    return dict(
        w1=w1.astype(jnp.float32),                    # (hid, C)
        b1=jnp.reshape(b1, (hid,)).astype(jnp.float32),
        w2t=jnp.transpose(w2).astype(jnp.float32),    # (hid, C)
        b2=jnp.reshape(b2, (1, C)).astype(jnp.float32),
        tsp=build_spatial_toeplitz(wsp, H, W),        # (2*HW, HW) f32
        bsp=jnp.reshape(bsp, (1, 1)).astype(jnp.float32),
    )


def cbam_apply(x, params, *, block_b=None):
    B, C, H, W = x.shape
    HW = H * W
    hid = params["w1"].shape[0]

    # bf16 HBM slabs (kernel is HBM-bound); compute stays f32 in-kernel.
    x2 = x.reshape(B, C, HW).astype(jnp.bfloat16)

    try:
        vmem_cap = int(pltpu.get_tpu_info().vmem_capacity_bytes)
    except Exception:
        vmem_cap = 64 << 20          # conservative: v7x per-TC physical VMEM

    if block_b is None:
        # Per-batch-row VMEM footprint: double-buffered bf16 in + out slabs
        # plus the f32 x / x_ca intermediates materialized in the kernel.
        per_b_bytes = C * HW * (2 * 2 + 2 * 2 + 4 + 4)
        fixed_bytes = 2 * HW * HW * 4 + 4 * hid * C * 4      # Toeplitz + MLP
        budget = max(vmem_cap // 3 - fixed_bytes, 1 << 20)
        cap_vmem = max(1, budget // per_b_bytes)
        cap_steps = max(1, B // 2)   # >=2 grid steps: megacore + pipeline depth
        cap = max(1, min(cap_vmem, cap_steps))
        divs = [d for d in range(1, B + 1) if B % d == 0 and d <= cap]
        slab_ok = [d for d in divs if d * C * HW * 2 >= (512 << 10)]
        # Smallest block whose slab is still >=512 KiB (more steps to overlap
        # DMA with compute), otherwise the biggest block that fits VMEM.
        block_b = min(slab_ok) if slab_ok else max(divs)
    assert B % block_b == 0
    grid = (B // block_b,)

    out = pl.pallas_call(
        cbam_kernel,
        out_shape=jax.ShapeDtypeStruct((B, C, HW), jnp.bfloat16),
        grid=grid,
        in_specs=[
            pl.BlockSpec((block_b, C, HW), lambda b: (b, 0, 0)),   # x slab
            _invariant_spec((hid, C)),                             # w1
            pl.BlockSpec(memory_space=pltpu.MemorySpace.SMEM),     # b1
            _invariant_spec((hid, C)),                             # w2.T
            _invariant_spec((1, C)),                               # b2
            _invariant_spec((2 * HW, HW)),                         # Toeplitz
            pl.BlockSpec(memory_space=pltpu.MemorySpace.SMEM),     # conv bias
        ],
        out_specs=pl.BlockSpec((block_b, C, HW), lambda b: (b, 0, 0)),
        compiler_params=pltpu.CompilerParams(
            dimension_semantics=("parallel",),   # megacore-shard batch on v7x
            vmem_limit_bytes=min(int(vmem_cap * 3 // 4), 96 << 20),
        ),
    )(x2, params["w1"], params["b1"], params["w2t"], params["b2"],
      params["tsp"], params["bsp"])
    return out.reshape(B, C, H, W)


def cbam_reference(x, w1, b1, w2, b2, wsp, bsp):
    """Pure-JAX f32 reference mirroring the PyTorch module (NCHW)."""
    avg = jnp.mean(x, axis=(2, 3))                  # (B, C)
    mx = jnp.max(x, axis=(2, 3))                    # (B, C)

    def fc(v):
        h = jnp.maximum(v @ w1.T + b1, 0.0)
        return h @ w2.T + b2

    ca = jax.nn.sigmoid(fc(avg) + fc(mx))           # (B, C)
    x = x * ca[:, :, None, None]

    avg_s = jnp.mean(x, axis=1, keepdims=True)      # (B, 1, H, W)
    max_s = jnp.max(x, axis=1, keepdims=True)       # (B, 1, H, W)
    inp = jnp.concatenate([avg_s, max_s], axis=1)   # (B, 2, H, W)
    w = wsp.reshape(1, 2, KSIZE, KSIZE)
    conv = lax.conv_general_dilated(
        inp, w, (1, 1), [(PAD, PAD), (PAD, PAD)],
        dimension_numbers=("NCHW", "OIHW", "NCHW")) + bsp[0, 0]
    return x * jax.nn.sigmoid(conv)


if __name__ == "__main__":
    B, C, H, W = 2, 32, 16, 16
    reduction_ratio = 16
    hidden = C // reduction_ratio                    # = 2

    key = jax.random.PRNGKey(0)
    kx, k1, k2, k3, k4, k5, k6 = jax.random.split(key, 7)

    x = jax.random.normal(kx, (B, C, H, W), jnp.float32)
    # ChannelAttention fc: Linear(C, C//r) then Linear(C//r, C)
    w1 = jax.random.normal(k1, (hidden, C), jnp.float32) * 0.1
    b1 = jax.random.normal(k2, (hidden,), jnp.float32) * 0.1
    w2 = jax.random.normal(k3, (C, hidden), jnp.float32) * 0.1
    b2 = jax.random.normal(k4, (C,), jnp.float32) * 0.1
    # SpatialAttention conv: Conv2d(2, 1, 7, padding=3)
    wsp = jax.random.normal(k5, (2, KSIZE * KSIZE), jnp.float32) * 0.1
    bsp = jax.random.normal(k6, (1, 1), jnp.float32) * 0.1

    params = cbam_prepare(w1, b1, w2, b2, wsp, bsp, H, W)   # once per weights
    out = jax.block_until_ready(cbam_apply(x, params))

    ref = jax.block_until_ready(cbam_reference(x, w1, b1, w2, b2, wsp, bsp))
    # bf16 HBM slabs -> ~0.4% relative quantization on input and output.
    np.testing.assert_allclose(np.asarray(out, np.float32), np.asarray(ref),
                               rtol=2e-2, atol=2e-2)
    print("KERNEL_OK")
</pallas_src>

<mosaic_0001>
module attributes {stable_mosaic.version = 11 : i64} {
  func.func @cbam_kernel(%arg0: i32, %arg1: memref<1x32x256xbf16, #tpu.memory_space<vmem>>, %arg2: memref<2x32xf32, #tpu.memory_space<vmem>>, %arg3: memref<2xf32, #tpu.memory_space<smem>>, %arg4: memref<2x32xf32, #tpu.memory_space<vmem>>, %arg5: memref<1x32xf32, #tpu.memory_space<vmem>>, %arg6: memref<512x256xf32, #tpu.memory_space<vmem>>, %arg7: memref<1x1xf32, #tpu.memory_space<smem>>, %arg8: memref<1x32x256xbf16, #tpu.memory_space<vmem>>) attributes {dimension_semantics = [#tpu.dimension_semantics<parallel>], iteration_bounds = array<i64: 2>, scalar_prefetch = 0 : i64, scratch_operands = 0 : i64, tpu.core_type = #tpu.core_type<tc>, window_params = [{transform_indices = @transform_0, window_bounds = array<i64: 1, 32, 256>}, {pipeline_mode = #tpu.pipeline_mode<synchronous>, transform_indices = @transform_1, window_bounds = array<i64: 2, 32>}, {transform_indices = @transform_2, window_bounds = array<i64: 2>}, {pipeline_mode = #tpu.pipeline_mode<synchronous>, transform_indices = @transform_3, window_bounds = array<i64: 2, 32>}, {pipeline_mode = #tpu.pipeline_mode<synchronous>, transform_indices = @transform_4, window_bounds = array<i64: 1, 32>}, {pipeline_mode = #tpu.pipeline_mode<synchronous>, transform_indices = @transform_5, window_bounds = array<i64: 512, 256>}, {transform_indices = @transform_6, window_bounds = array<i64: 1, 1>}, {transform_indices = @transform_7, window_bounds = array<i64: 1, 32, 256>}]} {
    %c0 = arith.constant 0 : index
    %c0_0 = arith.constant 0 : index
    %c0_1 = arith.constant 0 : index
    %0 = vector.load %arg1[%c0, %c0_0, %c0_1] : memref<1x32x256xbf16, #tpu.memory_space<vmem>>, vector<1x32x256xbf16>
    %1 = arith.extf %0 : vector<1x32x256xbf16> to vector<1x32x256xf32>
    %cst = arith.constant dense<0.000000e+00> : vector<1x32xf32>
    %2 = vector.multi_reduction <add>, %1, %cst [2] : vector<1x32x256xf32> to vector<1x32xf32>
    %cst_2 = arith.constant 3.906250e-03 : f32
    %3 = vector.broadcast %cst_2 : f32 to vector<1x32xf32>
    %4 = arith.mulf %2, %3 : vector<1x32xf32>
    %cst_3 = arith.constant dense<0xFF800000> : vector<1x32xf32>
    %5 = vector.multi_reduction <maximumf>, %1, %cst_3 [2] : vector<1x32x256xf32> to vector<1x32xf32>
    %6 = tpu.concatenate %4, %5 in 0 : vector<1x32xf32>, vector<1x32xf32> -> vector<2x32xf32>
    %cst_4 = arith.constant 0.000000e+00 : f32
    %7 = vector.broadcast %cst_4 : f32 to vector<2x32xf32>
    %c0_5 = arith.constant 0 : index
    %c0_6 = arith.constant 0 : index
    %8 = vector.load %arg5[%c0_5, %c0_6] : memref<1x32xf32, #tpu.memory_space<vmem>>, vector<1x32xf32>
    %9 = vector.broadcast %8 : vector<1x32xf32> to vector<2x32xf32>
    %10 = arith.addf %7, %9 : vector<2x32xf32>
    %c0_7 = arith.constant 0 : index
    %c0_8 = arith.constant 0 : index
    %11 = vector.load %arg2[%c0_7, %c0_8] : memref<2x32xf32, #tpu.memory_space<vmem>>, vector<1x32xf32>
    %12 = vector.broadcast %11 : vector<1x32xf32> to vector<2x32xf32>
    %13 = arith.mulf %6, %12 : vector<2x32xf32>
    %cst_9 = arith.constant dense<0.000000e+00> : vector<2xf32>
    %14 = vector.multi_reduction <add>, %13, %cst_9 [1] : vector<2x32xf32> to vector<2xf32>
    %15 = vector.shape_cast %14 : vector<2xf32> to vector<2x1xf32>
    %c0_10 = arith.constant 0 : index
    %16 = memref.load %arg3[%c0_10] : memref<2xf32, #tpu.memory_space<smem>>
    %17 = vector.broadcast %16 : f32 to vector<2x1xf32>
    %18 = arith.addf %15, %17 : vector<2x1xf32>
    %cst_11 = arith.constant 0.000000e+00 : f32
    %19 = vector.broadcast %cst_11 : f32 to vector<2x1xf32>
    %20 = arith.maximumf %18, %19 : vector<2x1xf32>
    %c0_12 = arith.constant 0 : index
    %c0_13 = arith.constant 0 : index
    %21 = vector.load %arg4[%c0_12, %c0_13] : memref<2x32xf32, #tpu.memory_space<vmem>>, vector<1x32xf32>
    %22 = vector.broadcast %20 : vector<2x1xf32> to vector<2x32xf32>
    %23 = vector.broadcast %21 : vector<1x32xf32> to vector<2x32xf32>
    %24 = arith.mulf %22, %23 : vector<2x32xf32>
    %25 = arith.addf %10, %24 : vector<2x32xf32>
    %c1 = arith.constant 1 : index
    %c0_14 = arith.constant 0 : index
    %26 = vector.load %arg2[%c1, %c0_14] : memref<2x32xf32, #tpu.memory_space<vmem>>, vector<1x32xf32>
    %27 = vector.broadcast %26 : vector<1x32xf32> to vector<2x32xf32>
    %28 = arith.mulf %6, %27 : vector<2x32xf32>
    %cst_15 = arith.constant dense<0.000000e+00> : vector<2xf32>
    %29 = vector.multi_reduction <add>, %28, %cst_15 [1] : vector<2x32xf32> to vector<2xf32>
    %30 = vector.shape_cast %29 : vector<2xf32> to vector<2x1xf32>
    %c1_16 = arith.constant 1 : index
    %31 = memref.load %arg3[%c1_16] : memref<2xf32, #tpu.memory_space<smem>>
    %32 = vector.broadcast %31 : f32 to vector<2x1xf32>
    %33 = arith.addf %30, %32 : vector<2x1xf32>
    %cst_17 = arith.constant 0.000000e+00 : f32
    %34 = vector.broadcast %cst_17 : f32 to vector<2x1xf32>
    %35 = arith.maximumf %33, %34 : vector<2x1xf32>
    %c1_18 = arith.constant 1 : index
    %c0_19 = arith.constant 0 : index
    %36 = vector.load %arg4[%c1_18, %c0_19] : memref<2x32xf32, #tpu.memory_space<vmem>>, vector<1x32xf32>
    %37 = vector.broadcast %35 : vector<2x1xf32> to vector<2x32xf32>
    %38 = vector.broadcast %36 : vector<1x32xf32> to vector<2x32xf32>
    %39 = arith.mulf %37, %38 : vector<2x32xf32>
    %40 = arith.addf %25, %39 : vector<2x32xf32>
    %41 = vector.extract_strided_slice %40 {offsets = [0, 0], sizes = [1, 32], strides = [1, 1]} : vector<2x32xf32> to vector<1x32xf32>
    %42 = vector.extract_strided_slice %40 {offsets = [1, 0], sizes = [1, 32], strides = [1, 1]} : vector<2x32xf32> to vector<1x32xf32>
    %43 = arith.addf %41, %42 : vector<1x32xf32>
    %44 = arith.negf %43 : vector<1x32xf32>
    %45 = math.exp %44 : vector<1x32xf32>
    %cst_20 = arith.constant 1.000000e+00 : f32
    %46 = vector.broadcast %cst_20 : f32 to vector<1x32xf32>
    %47 = arith.addf %46, %45 : vector<1x32xf32>
    %48 = arith.divf %46, %47 : vector<1x32xf32>
    %49 = vector.shape_cast %48 : vector<1x32xf32> to vector<1x32x1xf32>
    %50 = vector.broadcast %49 : vector<1x32x1xf32> to vector<1x32x256xf32>
    %51 = arith.mulf %1, %50 : vector<1x32x256xf32>
    %cst_21 = arith.constant dense<0.000000e+00> : vector<1x256xf32>
    %52 = vector.multi_reduction <add>, %51, %cst_21 [1] : vector<1x32x256xf32> to vector<1x256xf32>
    %cst_22 = arith.constant 3.125000e-02 : f32
    %53 = vector.broadcast %cst_22 : f32 to vector<1x256xf32>
    %54 = arith.mulf %52, %53 : vector<1x256xf32>
    %cst_23 = arith.constant dense<0xFF800000> : vector<1x256xf32>
    %55 = vector.multi_reduction <maximumf>, %51, %cst_23 [1] : vector<1x32x256xf32> to vector<1x256xf32>
    %56 = tpu.concatenate %54, %55 in 1 : vector<1x256xf32>, vector<1x256xf32> -> vector<1x512xf32>
    %c0_24 = arith.constant 0 : index
    %c0_25 = arith.constant 0 : index
    %57 = vector.load %arg6[%c0_24, %c0_25] : memref<512x256xf32, #tpu.memory_space<vmem>>, vector<512x256xf32>
    %cst_26 = arith.constant dense<0.000000e+00> : vector<1x256xf32>
    %58 = tpu.matmul %56, %57, %cst_26 {dimension_numbers = #tpu.dot_dimension_numbers<[1], [0], [0], [1], [0, 0, 1, 1], [], []>} : vector<1x512xf32>, vector<512x256xf32>, vector<1x256xf32> -> vector<1x256xf32>
    %c0_27 = arith.constant 0 : index
    %c0_28 = arith.constant 0 : index
    %59 = memref.load %arg7[%c0_27, %c0_28] : memref<1x1xf32, #tpu.memory_space<smem>>
    %60 = vector.broadcast %59 : f32 to vector<1x256xf32>
    %61 = arith.addf %58, %60 : vector<1x256xf32>
    %62 = arith.negf %61 : vector<1x256xf32>
    %63 = math.exp %62 : vector<1x256xf32>
    %cst_29 = arith.constant 1.000000e+00 : f32
    %64 = vector.broadcast %cst_29 : f32 to vector<1x256xf32>
    %65 = arith.addf %64, %63 : vector<1x256xf32>
    %66 = arith.divf %64, %65 : vector<1x256xf32>
    %67 = vector.shape_cast %66 : vector<1x256xf32> to vector<1x1x256xf32>
    %68 = vector.broadcast %67 : vector<1x1x256xf32> to vector<1x32x256xf32>
    %69 = arith.mulf %51, %68 : vector<1x32x256xf32>
    %70 = arith.truncf %69 : vector<1x32x256xf32> to vector<1x32x256xbf16>
    %c0_30 = arith.constant 0 : index
    %c0_31 = arith.constant 0 : index
    %c0_32 = arith.constant 0 : index
    %71 = vector.load %arg8[%c0_30, %c0_31, %c0_32] : memref<1x32x256xbf16, #tpu.memory_space<vmem>>, vector<1x32x256xbf16>
    tpu.vector_store %arg8[%c0_30, %c0_31, %c0_32], %70 {strides = array<i32>} : memref<1x32x256xbf16, #tpu.memory_space<vmem>>, vector<1x32x256xbf16>,
    return
  }
  func.func @transform_0(%arg0: i32) -> (i32, i32, i32) {
    %c0_i32 = arith.constant 0 : i32
    %c0_i32_0 = arith.constant 0 : i32
    %c0_i32_1 = arith.constant 0 : i32
    return %arg0, %c0_i32, %c0_i32_0 : i32, i32, i32
  }
  func.func @transform_1(%arg0: i32) -> (i32, i32) {
    %c0_i32 = arith.constant 0 : i32
    %c0_i32_0 = arith.constant 0 : i32
    %c0_i32_1 = arith.constant 0 : i32
    return %c0_i32, %c0_i32_0 : i32, i32
  }
  func.func @transform_2(%arg0: i32) -> i32 {
    %c0_i32 = arith.constant 0 : i32
    %c0_i32_0 = arith.constant 0 : i32
    return %c0_i32 : i32
  }
  func.func @transform_3(%arg0: i32) -> (i32, i32) {
    %c0_i32 = arith.constant 0 : i32
    %c0_i32_0 = arith.constant 0 : i32
    %c0_i32_1 = arith.constant 0 : i32
    return %c0_i32, %c0_i32_0 : i32, i32
  }
  func.func @transform_4(%arg0: i32) -> (i32, i32) {
    %c0_i32 = arith.constant 0 : i32
    %c0_i32_0 = arith.constant 0 : i32
    %c0_i32_1 = arith.constant 0 : i32
    return %c0_i32, %c0_i32_0 : i32, i32
  }
  func.func @transform_5(%arg0: i32) -> (i32, i32) {
    %c0_i32 = arith.constant 0 : i32
    %c0_i32_0 = arith.constant 0 : i32
    %c0_i32_1 = arith.constant 0 : i32
    return %c0_i32, %c0_i32_0 : i32, i32
  }
  func.func @transform_6(%arg0: i32) -> (i32, i32) {
    %c0_i32 = arith.constant 0 : i32
    %c0_i32_0 = arith.constant 0 : i32
    %c0_i32_1 = arith.constant 0 : i32
    return %c0_i32, %c0_i32_0 : i32, i32
  }
  func.func @transform_7(%arg0: i32) -> (i32, i32, i32) {
    %c0_i32 = arith.constant 0 : i32
    %c0_i32_0 = arith.constant 0 : i32
    %c0_i32_1 = arith.constant 0 : i32
    return %arg0, %c0_i32, %c0_i32_0 : i32, i32, i32
  }
}

</mosaic_0001>

<bundles_post_ra>
// kernel: tpu_custom_call.1
= control target key start
LH: loop header
LB: loop body
LE: loop exit
PB: predicated region body
PF: predicated region fallthrough
CT: control target
= control target key end

     0   :  { %s1778_s0 = inlined_call_operand.hbm [shape: bf16[2,32,256], index: 0, kind: input, shape index: {}]   ;;  %s1779_s1 = inlined_call_operand.vmem [shape: f32[2,32], index: 1, kind: input, shape index: {}]   ;;  %s1780_s2 = inlined_call_operand.vmem [shape: f32[2], index: 2, kind: input, shape index: {}]   ;;  %s1781_s3 = inlined_call_operand.vmem [shape: f32[2,32], index: 3, kind: input, shape index: {}]   ;;  %s1782_s4 = inlined_call_operand.vmem [shape: f32[1,32], index: 4, kind: input, shape index: {}]   ;;  %s1783_s5 = inlined_call_operand.hbm [shape: f32[512,256], index: 5, kind: input, shape index: {}]   ;;  %s1784_s6 = inlined_call_operand.<no memory space> [shape: f32[1,1], index: 6, kind: input, shape index: {}]   ;;  %s1785_s7 = inlined_call_operand.hbm [shape: bf16[2,32,256], index: 7, kind: output, shape index: {}]  }
   0x1   :  { %1790 = sst [smem:[#allocation17_spill]] %s1780_s2 }
   0x2   :  { %12 = sst [smem:[#allocation2]] %s1784_s6 }
   0x3   :  { %13 = vsyncpa [#allocation4], 0 }
   0x4   :  { %15 = vsyncpa [#allocation4 + $0x1], 0 }
   0x5   :  { %16 = vsyncpa [#allocation6], 0 }
   0x6   :  { %17 = vsyncpa [#allocation9], 0 }
   0x7   :  { %18 = vsyncpa [#allocation5], 0 }
   0x8   :  { %20 = vsyncpa [#allocation5 + $0x1], 0  ;;  %s1442_s26 = smov 0   ;;  %s1444_s27 = smov 0  }
   0x9   :  { %s1446_s28 = smov 0   ;;  %s1448_s29 = smov 0  }
   0xa LB: > { %1791 = sst [smem:[#allocation15_spill]] %s1383_s28  ;;  %s1463_s6 = sadd.s32 4294967295, %s1387_s29   ;;  %s1387_s29 = sphi %s1448_s29, %s1813_s29   ;;  %s1383_s28 = sphi %s1446_s28, %s1810_s28   ;;  %s1379_s27 = sphi %s1444_s27, %s1812_s27   ;;  %s1375_s26 = sphi %s1442_s26, %s1811_s26  }
   0xb   : > { %s986_s30 = sadd.s32 4294967294, %s1387_s29   ;;  %s1467_s8 = sadd.s32 1, %s1387_s29  }
   0xc   : > { %s33_s9 = sadd.s32 1, %s1383_s28  ;;  %s30_s10 = ssub.s32 %s1387_s29, %s1467_s8 }
   0xd   : > { %p40_p0 = scmp.ne.s32.totalorder %s1383_s28, %s1379_s27  ;;  %p31_p1 = scmp.eq.s32.totalorder %s30_s10, 0 }
   0xe   : > { %p41_p2 = scmp.eq.s32.totalorder %s1387_s29, 0  ;;  %p46_p3 = scmp.ne.s32.totalorder %s1379_s27, %s1375_s26 }
   0xf   : > { %p1786_p4 = scmp.eq.s32.totalorder %s1463_s6, 0  ;;  %p196_p7 = scmp.eq.s32.totalorder %s1463_s6, 1 }
  0x10   : > { %s1479_s11 = scalar_select %p31_p1, %s1383_s28, %s33_s9  }
  0x11   : > { %p1481_p5 = por %p41_p2, %p40_p0  ;;  %p1487_p6 = por %p1786_p4, %p46_p3 }
  0x12   : > { %1792 = sst [smem:[#allocation16_spill]] %s1479_s11  ;;  %p202_p8 = scmp.eq.s32.totalorder %s986_s30, 1 }
  0x13   : > { %s1794_s13 = scalar_select %p1487_p6, 1, 0 }
  0x14   : > { %p987_p9 = scmp.ge.s32.totalorder %s1387_s29, 1  ;;  %p209_p10 = scmp.lt.s32.totalorder %s1387_s29, 3 }
  0x15   : > { %p1494_p11 = por %p196_p7, %p40_p0  ;;  %p1498_p12 = por %p202_p8, %p46_p3 }
  0x16   : > { %p1502_p13 = pnand %p987_p9, %p209_p10  ;;  %s1798_s2 = sld [smem:[#allocation17_spill]] }
  0x17   : > { %s1795_s14 = scalar_select %p1494_p11, 1, 0 }
  0x18   : > { %s1796_s15 = scalar_select %p1498_p12, 1, 0 }
  0x19   : > { %p1167_p1 = pneg %p1502_p13  ;;  %p1184_p2 = scmp.lt.s32.totalorder %s1387_s29, 2 }
  0x1a   : > { %s1389_s22 = smov [#allocation8]  }
  0x1b   : > { %p1515_p7 = pnand %p1167_p1, %p1786_p4  ;;  %p1521_p3 = pnand %p1184_p2, %p1481_p5 }
  0x1c   : > { %s225_s19 = sshll.u32 %s1798_s2, 4  ;;  %s241_s23 = sshll.u32 %s1389_s22, 4  ;;  %s226_s19 = int_to_ptr.vmem [resolvable:$true] %s225_s19  ;;  %s1525_s23 = int_to_ptr.vmem [resolvable:$true] %s241_s23 }
  0x1d   : > { %s1240_s24 = scalar_lea.vmem %s226_s19, 16  ;;  %p1242_p9 = pneg %p1515_p7 }
  0x1e   : > { %p1241_p8 = scmp.ne.s32.totalorder %s226_s19, %s1240_s24  ;;  %p1248_p0 = scmp.lt.s32.totalorder %s226_s19, %s226_s19 }
  0x1f   : > { %p1249_p4 = scmp.lt.s32.totalorder %s1240_s24, %s1240_s24 }
  0x20   : > { %p1243_p10 = pnand %p1242_p9, %p1241_p8 }
  0x21   : > { %p1250_p12 = por %p1249_p4, %p1248_p0 }
  0x22   : > { %p1244_p1 = pneg %p1243_p10 }
  0x24   : > { %p1251_p11 = pnand %p1250_p12, %p1244_p1 }
  0x26   : > { %1254 = shalt.err (!%p1251_p11)
}
  0x27   : > { %s1390_s25 = smov [#allocation7]   ;;  %s258_s30 = sand.u32 1, %s1383_s28  }
  0x28   : > { %1170 = dma.vmem_to_smem (!%p1515_p7), %s226_s19, 16, %s1390_s25, [#allocation6]  }
  0x29   : > { %s1255_s12 = scalar_lea.hbm %s1783_s5, 16384 }
  0x2a   : > { %p1256_p5 = scmp.ne.s32.totalorder %s1783_s5, %s1255_s12  ;;  %p1262_p11 = scmp.lt.u32.totalorder %s1255_s12, %s1783_s5 }
  0x2c   : > { %p1258_p4 = pnand %p1256_p5, %p1242_p9 }
  0x2e   : > { %p1259_p12 = pneg %p1258_p4 }
  0x30   : > { %p1264_p0 = pnand %p1262_p11, %p1259_p12 }
  0x32   : > { %1267 = shalt.err (!%p1264_p0)
}
  0x33   : > { %s1268_s19 = scalar_lea.vmem %s1525_s23, 16384  ;;  %p1276_p1 = scmp.lt.s32.totalorder %s1525_s23, %s1525_s23 }
  0x34   : > { %p1269_p2 = scmp.ne.s32.totalorder %s1525_s23, %s1268_s19  ;;  %p1277_p5 = scmp.lt.s32.totalorder %s1268_s19, %s1268_s19 }
  0x36   : > { %p1271_p8 = pnand %p1269_p2, %p1242_p9  ;;  %p1278_p4 = por %p1277_p5, %p1276_p1 }
  0x38   : > { %p1272_p10 = pneg %p1271_p8 }
  0x3a   : > { %p1279_p6 = pnand %p1278_p4, %p1272_p10 }
  0x3c   : > { %1282 = shalt.err (!%p1279_p6)
}
  0x3d   : > { %s1391_s25 = smov 256   ;;  %s1392_s9 = smov 16  }
  0x3e   : > { %1173 = dma.hbm_to_vmem [thread:$0]  (!%p1515_p7), %s1783_s5, 16384, %s1525_s23, [#allocation9], %s1391_s25, %s1391_s25, %s1392_s9  }
  0x3f   : > { %s991_s17 = sshll.u32 %s258_s30, 5  ;;  %s1017_s18 = sshll.u32 %s1387_s29, 9 }
  0x40   : > { %s1564_s19 = scalar_lea.hbm %s1778_s0, %s1017_s18  ;;  %s262_s2 = scalar_lea.vmem [#allocation3], %s991_s17 }
  0x41   : > { %s269_s11 = sshll.u32 %s262_s2, 4  ;;  %s1568_s20 = scalar_lea.sflag [#allocation4], %s258_s30  ;;  %s1566_s11 = int_to_ptr.vmem [resolvable:$true] %s269_s11 }
  0x42   : > { %s1283_s28 = scalar_lea.hbm %s1564_s19, 512  ;;  %p1285_p7 = pneg %p1521_p3 }
  0x43   : > { %p1284_p6 = scmp.ne.s32.totalorder %s1564_s19, %s1283_s28  ;;  %s1288_s9 = scalar_lea.hbm %s1778_s0, 1024 }
  0x44   : > { %p1289_p11 = scmp.lt.u32.totalorder %s1564_s19, %s1778_s0  ;;  %p1290_p0 = scmp.lt.u32.totalorder %s1288_s9, %s1283_s28 }
  0x45   : > { %p1286_p9 = pnand %p1285_p7, %p1284_p6  ;;  %p1292_p8 = scmp.lt.u32.totalorder %s1283_s28, %s1564_s19 }
  0x46   : > { %p1291_p2 = por %p1290_p0, %p1289_p11 }
  0x47   : > { %p1287_p12 = pneg %p1286_p9 }
  0x48   : > { %p1293_p10 = por %p1292_p8, %p1291_p2 }
  0x4a   : > { %p1294_p1 = pnand %p1293_p10, %p1287_p12 }
  0x4c   : > { %1297 = shalt.err (!%p1294_p1)
}
  0x4d   : > { %s1298_s2 = scalar_lea.vmem %s1566_s11, 512  ;;  %s1393_s30 = smov [#allocation3]  }
  0x4e   : > { %p1299_p5 = scmp.ne.s32.totalorder %s1566_s11, %s1298_s2  ;;  %s1303_s17 = sshll.u32 %s1393_s30, 4  ;;  %s1304_s17 = int_to_ptr.vmem [resolvable:$false] %s1303_s17 }
  0x4f   : > { %s1305_s18 = scalar_lea.vmem %s1304_s17, 1024  ;;  %p1306_p9 = scmp.lt.s32.totalorder %s1566_s11, %s1304_s17 }
  0x50   : > { %p1301_p4 = pnand %p1299_p5, %p1285_p7  ;;  %p1307_p11 = scmp.lt.s32.totalorder %s1305_s18, %s1298_s2 }
  0x52   : > { %p1302_p6 = pneg %p1301_p4  ;;  %p1308_p0 = por %p1307_p11, %p1306_p9 }
  0x54   : > { %p1309_p2 = pnand %p1308_p0, %p1302_p6 }
  0x56   : > { %1312 = shalt.err (!%p1309_p2)
}
  0x57   : > { %s1394_s28 = smov 128   ;;  %s1395_s22 = smov 8  }
  0x58   : > { %1177 = dma.hbm_to_vmem [thread:$0]  (!%p1521_p3), %s1564_s19, 512, %s1566_s11, %s1568_s20, %s1394_s28, %s1394_s28, %s1395_s22  }
  0x59   : > { %281 = sbr.rel (%p1502_p13) target bundleno = 864 (0x360), region = 48  ;;  %s1599_s24 = sand.u32 (!%p1502_p13), 1, %s1379_s27  }
  0x5a   : > { %s995_s23 = sshll.u32 (!%p1502_p13), %s1599_s24, 5  ;;  %s284_s25 = scalar_lea.sflag (!%p1502_p13), [#allocation4], %s1599_s24 }
  0x5b   : > { %s287_s9 = scalar_lea.vmem (!%p1502_p13), [#allocation3], %s995_s23  ;;  %p1801_p7 = scmp.ne.s32.totalorder (!%p1502_p13), %s1794_s13, 0 }
  0x60   : > { %1358 = dma.done.wait (%p1801_p7), %s284_s25, 512  }
  0x61   : > { %1360 = vsyncadd (%p1801_p7), %s284_s25, 4294966784  ;;  %p1802_p3 = scmp.eq.s32.totalorder %s1463_s6, 0 }
  0x63   : > { %1362 = dma.done.wait (%p1802_p3), [#allocation6], 16   ;;  %p1803_p13 = pmov %p1802_p3 }
  0x64   : > { %p1804_p12 = pmov %p1802_p3 }
  0x65   : > { %1364 = vsyncadd (%p1803_p13), [#allocation6], 4294967280 }
  0x66   : > { %1366 = dma.done.wait (%p1804_p12), [#allocation9], 16384   ;;  %p1805_p8 = pmov %p1802_p3 }
  0x68   : > { %1368 = vsyncadd (%p1805_p8), [#allocation9], 4294950912 }
  0x69   : > { %300 = sfence }
  0x6a   : > { %v329_v0 = vld [vmem:[%s287_s9 + $0x10] sm:$0xff]  ;;  %v327_v1 = vld [vmem:[%s287_s9] sm:$0xff]  ;;  %v330_v2 = vld [vmem:[%s287_s9 + $0x18] sm:$0xff]  ;;  %v371_v20 = vlaneseq  ;;  %vm382_vm0 = vcmask 130112   ;;  %vm389_vm1 = vcmask 195712   ;;  %vm396_vm2 = vcmask 261312  }
  0x6b   : > { %v1617_v3 = vunpack.c.l.bf16 %v329_v0  ;;  %v1619_v4 = vunpack.c.h.bf16 %v329_v0  ;;  %v1621_v5 = vunpack.c.l.bf16 %v327_v1  ;;  %v1623_v6 = vunpack.c.h.bf16 %v327_v1  ;;  %v328_v7 = vld [vmem:[%s287_s9 + $0x8] sm:$0xff]  ;;  %v1002_v54 = vld [vmem:[%s1779_s1 + $0x1] ss:$0 sm:$0xff]  ;;  %v1000_v55 = vld [vmem:[%s1779_s1] ss:$0 sm:$0xff]  ;;  %s1003_s19 = sld [smem:[#allocation7 + $0x1]] }
  0x6c   : > { %v1625_v8 = vunpack.c.l.bf16 %v330_v2  ;;  %v1627_v9 = vunpack.c.h.bf16 %v330_v2  ;;  %v1629_v10 = vunpack.c.l.bf16 %v328_v7  ;;  %v1631_v11 = vunpack.c.h.bf16 %v328_v7  ;;  %v550_v63 = vld [vmem:[#allocation8 + $0x8] sm:$0xff]  ;;  %v552_v0 = vld [vmem:[#allocation8 + $0x18] sm:$0xff]  ;;  %s443_s20 = sld [smem:[#allocation7]]  ;;  %s677_s28 = sld [smem:[#allocation2]] }
  0x6d   : > { %v345_v12 = vadd.f32 %v1619_v4, %v1617_v3  ;;  %v339_v13 = vadd.f32 %v1623_v6, %v1621_v5  ;;  %v355_v17 = vmax.f32 %v1621_v5, %v1623_v6  ;;  %v361_v18 = vmax.f32 %v1617_v3, %v1619_v4  ;;  %v614_v1 = vld [vmem:[#allocation8 + $0x208] sm:$0xff]  ;;  %v616_v7 = vld [vmem:[#allocation8 + $0x218] sm:$0xff]  ;;  %s1022_s22 = sshll.u32 %s1463_s6, 9  ;;  %s326_s25 = scalar_lea.vmem [#allocation10], %s995_s23 }
  0x6e   : > { %v348_v14 = vadd.f32 %v1627_v9, %v1625_v8  ;;  %v342_v15 = vadd.f32 %v1631_v11, %v1629_v10  ;;  %v358_v16 = vmax.f32 %v1629_v10, %v1631_v11  ;;  %v364_v19 = vmax.f32 %v1625_v8, %v1627_v9  ;;  %s891_s9 = sshll.u32 %s326_s25, 4  ;;  %s1732_s11 = scalar_lea.hbm %s1785_s7, %s1022_s22  ;;  %s1734_s9 = int_to_ptr.vmem [resolvable:$true] %s891_s9 }
  0x6f   : > { %346 = vadd.xlane.f32.xlu1 %v345_v12  ;;  %340 = vadd.xlane.f32.xlu0 %v339_v13  ;;  %v372_v21 = vand.u32 127, %v371_v20  ;;  %v1649_v23 = vshrl.u32 %v371_v20, 7  ;;  %vm423_vm3 = vcmask 1040384   ;;  %vm439_vm4 = vcmask 254976   ;;  %v549_v12 = vld [vmem:[#allocation8] sm:$0xff]  ;;  %v551_v13 = vld [vmem:[#allocation8 + $0x10] sm:$0xff] }
  0x70   : > { %v1023_v2 = vpack.c.bf16 %v552_v0, %v550_v63  ;;  %v556_v20 = vld [vmem:[#allocation8 + $0x38] sm:$0xff]  ;;  %v629_v63 = vld [vmem:[#allocation8 + $0x280] sm:$0xff]  ;;  %s878_s13 = scalar_lea.sflag [#allocation5], %s1599_s24  ;;  %s1313_s16 = scalar_lea.vmem %s1734_s9, 512 }
  0x71   : > { %v377_v22 = vadd.s32 4294967288, %v372_v21  ;;  %v384_v26 = vadd.s32 4294967280, %v372_v21  ;;  %v375_v28 = vsub.s32 %v372_v21, %v1649_v23  ;;  %v391_v30 = vadd.s32 4294967272, %v372_v21  ;;  %v618_v21 = vld [vmem:[#allocation8 + $0x228] sm:$0xff]  ;;  %p1314_p10 = scmp.ne.s32.totalorder %s1734_s9, %s1313_s16  ;;  %p1806_p1 = scmp.ne.s32.totalorder %s1795_s14, 0 }
  0x72   : > { %1024 = vmatprep.subr.bf16.mxu1 %v1023_v2  ;;  %v570_v2 = vld [vmem:[#allocation8 + $0xa8] sm:$0xff]  ;;  %s1396_s21 = smov [#allocation10]  }
  0x73   : > { %349 = vadd.xlane.f32.xlu1 %v348_v14  ;;  %343 = vadd.xlane.f32.xlu0 %v342_v15  ;;  %v380_v27 = vsub.s32 %v377_v22, %v1649_v23  ;;  %v387_v34 = vsub.s32 %v384_v26, %v1649_v23  ;;  %v394_v38 = vsub.s32 %v391_v30, %v1649_v23  ;;  %v620_v22 = vld [vmem:[#allocation8 + $0x238] sm:$0xff]  ;;  %v553_v26 = vld [vmem:[#allocation8 + $0x20] sm:$0xff]  ;;  %v619_v30 = vld [vmem:[#allocation8 + $0x230] sm:$0xff]  ;;  %p1315_p5 = pnand %p1314_p10, %p1806_p1 }
  0x74   : > { %v1087_v14 = vpack.c.bf16 %v616_v7, %v614_v1  ;;  %v1025_v15 = vpack.c.bf16 %v551_v13, %v549_v12  ;;  %v631_v1 = vld [vmem:[#allocation8 + $0x290] sm:$0xff]  ;;  %v572_v7 = vld [vmem:[#allocation8 + $0xb8] sm:$0xff]  ;;  %v634_v12 = vld [vmem:[#allocation8 + $0x2a8] sm:$0xff] }
  0x75   : > { %v636_v13 = vld [vmem:[#allocation8 + $0x2b8] sm:$0xff]  ;;  %p1316_p4 = pneg %p1315_p5 }
  0x76   : > { %1088 = vmatprep.subr.bf16.mxu0 %v1087_v14  ;;  %1026 = vmatpush1.bf16.msra.mxu1 %v1025_v15  ;;  %v1105_v15 = vpack.c.bf16 %v631_v1, %v629_v63 }
  0x77   : > { %359 = vmax.xlane.f32.xlu1 %v358_v16  ;;  %356 = vmax.xlane.f32.xlu0 %v355_v17  ;;  %v613_v16 = vld [vmem:[#allocation8 + $0x200] sm:$0xff]  ;;  %v615_v17 = vld [vmem:[#allocation8 + $0x210] sm:$0xff] }
  0x7b   : > { %362 = vmax.xlane.f32.xlu0 %v361_v18  ;;  %365 = vmax.xlane.f32.xlu1 %v364_v19  ;;  %v554_v18 = vld [vmem:[#allocation8 + $0x28] sm:$0xff]  ;;  %v1089_v19 = vpack.c.bf16 %v615_v17, %v613_v16  ;;  %v1043_v16 = vpack.c.bf16 %v572_v7, %v570_v2  ;;  %v569_v17 = vld [vmem:[#allocation8 + $0xa0] sm:$0xff]  ;;  %v464_v7 = vstv %s1003_s19  ;;  %s1317_s19 = sshll.u32 %s1396_s21, 4  ;;  %s1318_s19 = int_to_ptr.vmem [resolvable:$false] %s1317_s19 }
  0x7c   : > { %p1320_p6 = scmp.lt.s32.totalorder %s1734_s9, %s1318_s19 }
  0x7d   : > { %1090 = vmatpush1.bf16.msra.mxu0 %v1089_v19  ;;  %v633_v19 = vld [vmem:[#allocation8 + $0x2a0] sm:$0xff] }
  0xfc   : > { %v347_v24 = vpop.xlane.xlu1 %346  ;;  %v341_v25 = vpop.xlane.xlu0 %340 }
  0xfd   : > { %v351_v29 = vmul.f32 0.00390625, %v341_v25  ;;  %v353_v35 = vmul.f32 0.00390625, %v347_v24  ;;  %v1027_v24 = vpack.c.bf16 %v556_v20, %v554_v18  ;;  %v1091_v25 = vpack.c.bf16 %v620_v22, %v618_v21  ;;  %v571_v18 = vld [vmem:[#allocation8 + $0xb0] sm:$0xff]  ;;  %v574_v22 = vld [vmem:[#allocation8 + $0xc8] sm:$0xff] }
  0xfe   : > { %v1107_v20 = vpack.c.bf16 %v636_v13, %v634_v12  ;;  %v635_v21 = vld [vmem:[#allocation8 + $0x2b0] sm:$0xff]  ;;  %v444_v12 = vstv %s443_s20  ;;  %s1319_s20 = scalar_lea.vmem %s1318_s19, 1024 }
  0xff   : > { %v376_v37 = vrot.slane %v351_v29, %v375_v28  ;;  %v388_v45 = vrot.slane %v353_v35, %v387_v34  ;;  %1028 = vmatprep.subr.bf16.mxu1 %v1027_v24  ;;  %1092 = vmatprep.subr.bf16.mxu0 %v1091_v25  ;;  %v622_v35 = vld [vmem:[#allocation8 + $0x248] sm:$0xff]  ;;  %v576_v24 = vld [vmem:[#allocation8 + $0xd8] sm:$0xff]  ;;  %p1321_p9 = scmp.lt.s32.totalorder %s1319_s20, %s1313_s16 }
 0x100   : > { %v350_v31 = vpop.xlane.xlu1 %349  ;;  %v344_v32 = vpop.xlane.xlu0 %343  ;;  %v638_v25 = vld [vmem:[#allocation8 + $0x2c8] sm:$0xff] }
 0x101   : > { %v352_v33 = vmul.f32 0.00390625, %v344_v32  ;;  %v354_v39 = vmul.f32 0.00390625, %v350_v31  ;;  %v558_v31 = vld [vmem:[#allocation8 + $0x48] sm:$0xff]  ;;  %v560_v32 = vld [vmem:[#allocation8 + $0x58] sm:$0xff]  ;;  %p1322_p11 = por %p1321_p9, %p1320_p6 }
 0x103   : > { %v381_v36 = vrot.slane %v352_v33, %v380_v27  ;;  %v395_v46 = vrot.slane %v354_v39, %v394_v38  ;;  %v559_v39 = vld [vmem:[#allocation8 + $0x50] sm:$0xff]  ;;  %p1323_p0 = pnand %p1322_p11, %p1316_p4 }
 0x104   : > { %v360_v40 = vpop.xlane.xlu1 %359  ;;  %v357_v41 = vpop.xlane.xlu0 %356 }
 0x105   : > { %v383_v42 = vsel %vm382_vm0, %v381_v36, %v376_v37  ;;  %v410_v43 = vrot.slane %v360_v40, %v380_v27  ;;  %v406_v44 = vrot.slane %v357_v41, %v375_v28  ;;  %v555_v27 = vld [vmem:[#allocation8 + $0x30] sm:$0xff]  ;;  %v617_v28 = vld [vmem:[#allocation8 + $0x220] sm:$0xff]  ;;  %v624_v36 = vld [vmem:[#allocation8 + $0x258] sm:$0xff] }
 0x106   : > { %v390_v51 = vsel %vm389_vm1, %v388_v45, %v383_v42  ;;  %v1029_v29 = vpack.c.bf16 %v555_v27, %v553_v26  ;;  %v1093_v33 = vpack.c.bf16 %v619_v30, %v617_v28  ;;  %v557_v37 = vld [vmem:[#allocation8 + $0x40] sm:$0xff]  ;;  %v623_v41 = vld [vmem:[#allocation8 + $0x250] sm:$0xff]  ;;  %v626_v45 = vld [vmem:[#allocation8 + $0x268] sm:$0xff]  ;;  %v1045_v27 = vpack.c.bf16 %v571_v18, %v569_v17 }
 0x107   : > { %v411_v52 = vsel %vm382_vm0, %v410_v43, %v406_v44  ;;  %v397_v57 = vsel %vm396_vm2, %v395_v46, %v390_v51  ;;  %v621_v40 = vld [vmem:[#allocation8 + $0x240] sm:$0xff]  ;;  %v1033_v42 = vpack.c.bf16 %v559_v39, %v557_v37  ;;  %v562_v43 = vld [vmem:[#allocation8 + $0x68] sm:$0xff]  ;;  %v564_v44 = vld [vmem:[#allocation8 + $0x78] sm:$0xff]  ;;  %v1109_v28 = vpack.c.bf16 %v635_v21, %v633_v19 }
 0x108   : > { %v363_v47 = vpop.xlane.xlu0 %362  ;;  %v366_v48 = vpop.xlane.xlu1 %365  ;;  %1030 = vmatpush1.bf16.msra.mxu1 %v1029_v29  ;;  %1094 = vmatpush1.bf16.msra.mxu0 %v1093_v33  ;;  %v1097_v46 = vpack.c.bf16 %v623_v41, %v621_v40  ;;  %v640_v26 = vld [vmem:[#allocation8 + $0x2d8] sm:$0xff]  ;;  %v1047_v29 = vpack.c.bf16 %v576_v24, %v574_v22  ;;  %v573_v30 = vld [vmem:[#allocation8 + $0xc0] sm:$0xff]  ;;  %v642_v37 = vld [vmem:[#allocation8 + $0x2e8] sm:$0xff] }
 0x109   : > { %v415_v49 = vrot.slane %v363_v47, %v387_v34  ;;  %v420_v50 = vrot.slane %v366_v48, %v394_v38  ;;  %v1031_v34 = vpack.c.bf16 %v560_v32, %v558_v31  ;;  %v1095_v38 = vpack.c.bf16 %v624_v36, %v622_v35  ;;  %v628_v48 = vld [vmem:[#allocation8 + $0x278] sm:$0xff]  ;;  %v575_v31 = vld [vmem:[#allocation8 + $0xd0] sm:$0xff]  ;;  %v637_v32 = vld [vmem:[#allocation8 + $0x2c0] sm:$0xff] }
 0x10a   : > { %v1035_v47 = vpack.c.bf16 %v564_v44, %v562_v43  ;;  %v1099_v51 = vpack.c.bf16 %v628_v48, %v626_v45  ;;  %v1111_v33 = vpack.c.bf16 %v640_v26, %v638_v25  ;;  %v578_v35 = vld [vmem:[#allocation8 + $0xe8] sm:$0xff]  ;;  %v580_v36 = vld [vmem:[#allocation8 + $0xf8] sm:$0xff]  ;;  %v1049_v39 = vpack.c.bf16 %v575_v31, %v573_v30  ;;  %v579_v43 = vld [vmem:[#allocation8 + $0xf0] sm:$0xff] }
 0x10b   : > { %v416_v53 = vsel %vm389_vm1, %v415_v49, %v411_v52  ;;  %1032 = vmatprep.subr.bf16.mxu1 %v1031_v34  ;;  %v561_v49 = vld [vmem:[#allocation8 + $0x60] sm:$0xff]  ;;  %1096 = vmatprep.subr.bf16.mxu0 %v1095_v38  ;;  %v639_v34 = vld [vmem:[#allocation8 + $0x2d0] sm:$0xff]  ;;  %v644_v38 = vld [vmem:[#allocation8 + $0x2f8] sm:$0xff]  ;;  %v1051_v41 = vpack.c.bf16 %v580_v36, %v578_v35 }
 0x10c   : > { %v421_v56 = vsel %vm396_vm2, %v420_v50, %v416_v53  ;;  %v563_v50 = vld [vmem:[#allocation8 + $0x70] sm:$0xff]  ;;  %v625_v52 = vld [vmem:[#allocation8 + $0x260] sm:$0xff]  ;;  %1034 = vmatpush1.bf16.msra.mxu1 %v1033_v42  ;;  %1098 = vmatpush1.bf16.msra.mxu0 %v1097_v46  ;;  %v1113_v40 = vpack.c.bf16 %v639_v34, %v637_v32  ;;  %v1115_v45 = vpack.c.bf16 %v644_v38, %v642_v37  ;;  %v584_v48 = vld [vmem:[#allocation8 + $0x118] sm:$0xff] }
 0x10d   : > { %v424_v58 = vsel %vm423_vm3, %v397_v57, %v421_v56  ;;  %v627_v53 = vld [vmem:[#allocation8 + $0x270] sm:$0xff]  ;;  %v630_v56 = vld [vmem:[#allocation8 + $0x288] sm:$0xff]  ;;  %v632_v57 = vld [vmem:[#allocation8 + $0x298] sm:$0xff]  ;;  %1036 = vmatprep.subr.bf16.mxu1 %v1035_v47  ;;  %1100 = vmatprep.subr.bf16.mxu0 %v1099_v51 }
 0x10e   : > { %v459_v59 = vmul.f32 %v1002_v54, %v424_v58  ;;  %v438_v60 = vmul.f32 %v1000_v55, %v424_v58  ;;  %v566_v54 = vld [vmem:[#allocation8 + $0x88] sm:$0xff]  ;;  %v568_v55 = vld [vmem:[#allocation8 + $0x98] sm:$0xff]  ;;  %v1037_v58 = vpack.c.bf16 %v563_v50, %v561_v49  ;;  %v1103_v0 = vpack.c.bf16 %v632_v57, %v630_v56  ;;  %v577_v42 = vld [vmem:[#allocation8 + $0xe0] sm:$0xff] }
 0x10f   : > { %v641_v44 = vld [vmem:[#allocation8 + $0x2e0] sm:$0xff]  ;;  %v643_v46 = vld [vmem:[#allocation8 + $0x2f0] sm:$0xff]  ;;  %v582_v47 = vld [vmem:[#allocation8 + $0x108] sm:$0xff]  ;;  %v1053_v51 = vpack.c.bf16 %v579_v43, %v577_v42 }
 0x110   : > { %v460_v61 = vsel %vm439_vm4, %v459_v59, 0.0  ;;  %v440_v62 = vsel %vm439_vm4, %v438_v60, 0.0  ;;  %v1101_v59 = vpack.c.bf16 %v627_v53, %v625_v52  ;;  %v1039_v60 = vpack.c.bf16 %v568_v55, %v566_v54  ;;  %1038 = vmatpush1.bf16.msra.mxu1 %v1037_v58  ;;  %v646_v49 = vld [vmem:[#allocation8 + $0x308] sm:$0xff]  ;;  %v648_v50 = vld [vmem:[#allocation8 + $0x318] sm:$0xff]  ;;  %v581_v54 = vld [vmem:[#allocation8 + $0x100] sm:$0xff] }
 0x111   : > { %461 = vadd.xlane.f32.xlu1 %v460_v61  ;;  %441 = vadd.xlane.f32.xlu0 %v440_v62  ;;  %v565_v61 = vld [vmem:[#allocation8 + $0x80] sm:$0xff]  ;;  %v567_v62 = vld [vmem:[#allocation8 + $0x90] sm:$0xff]  ;;  %v1117_v52 = vpack.c.bf16 %v643_v46, %v641_v44  ;;  %v1055_v53 = vpack.c.bf16 %v584_v48, %v582_v47  ;;  %v1119_v57 = vpack.c.bf16 %v648_v50, %v646_v49  ;;  %v590_v38 = vld [vmem:[#allocation8 + $0x148] sm:$0xff] }
 0x112   : > { %v1041_v14 = vpack.c.bf16 %v567_v62, %v565_v61  ;;  %1102 = vmatpush1.bf16.msra.mxu0 %v1101_v59  ;;  %1040 = vmatprep.subr.bf16.mxu1 %v1039_v60  ;;  %v583_v55 = vld [vmem:[#allocation8 + $0x110] sm:$0xff]  ;;  %v645_v56 = vld [vmem:[#allocation8 + $0x300] sm:$0xff]  ;;  %v586_v59 = vld [vmem:[#allocation8 + $0x128] sm:$0xff] }
 0x113   : > { %1104 = vmatprep.subr.bf16.mxu0 %v1103_v0  ;;  %v647_v58 = vld [vmem:[#allocation8 + $0x310] sm:$0xff]  ;;  %v588_v60 = vld [vmem:[#allocation8 + $0x138] sm:$0xff]  ;;  %v650_v61 = vld [vmem:[#allocation8 + $0x328] sm:$0xff]  ;;  %v1057_v63 = vpack.c.bf16 %v583_v55, %v581_v54 }
 0x114   : > { %1042 = vmatpush1.bf16.msra.mxu1 %v1041_v14  ;;  %v652_v62 = vld [vmem:[#allocation8 + $0x338] sm:$0xff]  ;;  %v1121_v0 = vpack.c.bf16 %v647_v58, %v645_v56  ;;  %v1059_v1 = vpack.c.bf16 %v588_v60, %v586_v59  ;;  %v1001_v17 = vld [vmem:[%s1781_s3] ss:$0 sm:$0xff]  ;;  %v587_v32 = vld [vmem:[#allocation8 + $0x130] sm:$0xff] }
 0x115   : > { %1044 = vmatprep.subr.bf16.mxu1 %v1043_v16  ;;  %v1123_v2 = vpack.c.bf16 %v652_v62, %v650_v61  ;;  %v999_v21 = vld [vmem:[%s1782_s4] ss:$0 sm:$0xff]  ;;  %v651_v36 = vld [vmem:[#allocation8 + $0x330] sm:$0xff]  ;;  %v656_v42 = vld [vmem:[#allocation8 + $0x358] sm:$0xff]  ;;  %v1673_v61 = vsub.s32 0, %v1649_v23 }
 0x116   : > { %1106 = vmatpush1.bf16.msra.mxu0 %v1105_v15  ;;  %v585_v31 = vld [vmem:[#allocation8 + $0x120] sm:$0xff]  ;;  %v591_v44 = vld [vmem:[#allocation8 + $0x150] sm:$0xff]  ;;  %v594_v50 = vld [vmem:[#allocation8 + $0x168] sm:$0xff] }
 0x117   : > { %1108 = vmatprep.subr.bf16.mxu0 %v1107_v20  ;;  %v1004_v20 = vld [vmem:[%s1781_s3 + $0x1] ss:$0 sm:$0xff]  ;;  %v1061_v35 = vpack.c.bf16 %v587_v32, %v585_v31  ;;  %v655_v48 = vld [vmem:[#allocation8 + $0x350] sm:$0xff]  ;;  %v660_v54 = vld [vmem:[#allocation8 + $0x378] sm:$0xff] }
 0x118   : > { %1046 = vmatpush1.bf16.msra.mxu1 %v1045_v27  ;;  %v589_v43 = vld [vmem:[#allocation8 + $0x140] sm:$0xff]  ;;  %v595_v56 = vld [vmem:[#allocation8 + $0x170] sm:$0xff]  ;;  %v606_v32 = vld [vmem:[#allocation8 + $0x1c8] sm:$0xff] }
 0x119   : > { %1048 = vmatprep.subr.bf16.mxu1 %v1047_v29  ;;  %v1065_v46 = vpack.c.bf16 %v591_v44, %v589_v43  ;;  %v653_v47 = vld [vmem:[#allocation8 + $0x340] sm:$0xff]  ;;  %v659_v60 = vld [vmem:[#allocation8 + $0x370] sm:$0xff]  ;;  %v610_v44 = vld [vmem:[#allocation8 + $0x1e8] sm:$0xff] }
 0x11a   : > { %1110 = vmatpush1.bf16.msra.mxu0 %v1109_v28  ;;  %v1129_v49 = vpack.c.bf16 %v655_v48, %v653_v47  ;;  %v593_v55 = vld [vmem:[#allocation8 + $0x160] sm:$0xff]  ;;  %v667_v31 = vld [vmem:[#allocation8 + $0x3b0] sm:$0xff]  ;;  %v674_v48 = vld [vmem:[#allocation8 + $0x3e8] sm:$0xff] }
 0x11b   : > { %1112 = vmatprep.subr.bf16.mxu0 %v1111_v33  ;;  %v649_v33 = vld [vmem:[#allocation8 + $0x320] sm:$0xff]  ;;  %v1069_v58 = vpack.c.bf16 %v595_v56, %v593_v55  ;;  %v671_v43 = vld [vmem:[#allocation8 + $0x3d0] sm:$0xff] }
 0x11c   : > { %1050 = vmatpush1.bf16.msra.mxu1 %v1049_v39  ;;  %v1125_v37 = vpack.c.bf16 %v651_v36, %v649_v33  ;;  %v592_v39 = vld [vmem:[#allocation8 + $0x158] sm:$0xff]  ;;  %v657_v59 = vld [vmem:[#allocation8 + $0x360] sm:$0xff] }
 0x11d   : > { %1052 = vmatprep.subr.bf16.mxu1 %v1051_v41  ;;  %v1063_v41 = vpack.c.bf16 %v592_v39, %v590_v38  ;;  %v1133_v62 = vpack.c.bf16 %v659_v60, %v657_v59  ;;  %v672_v36 = vld [vmem:[#allocation8 + $0x3d8] sm:$0xff]  ;;  %v605_v39 = vld [vmem:[#allocation8 + $0x1c0] sm:$0xff] }
 0x11e   : > { %1114 = vmatpush1.bf16.msra.mxu0 %v1113_v40  ;;  %v654_v40 = vld [vmem:[#allocation8 + $0x348] sm:$0xff] }
 0x11f   : > { %1116 = vmatprep.subr.bf16.mxu0 %v1115_v45  ;;  %v1127_v45 = vpack.c.bf16 %v656_v42, %v654_v40  ;;  %v607_v40 = vld [vmem:[#allocation8 + $0x1d0] sm:$0xff] }
 0x120   : > { %1054 = vmatpush1.bf16.msra.mxu1 %v1053_v51  ;;  %v596_v51 = vld [vmem:[#allocation8 + $0x178] sm:$0xff]  ;;  %v1081_v42 = vpack.c.bf16 %v607_v40, %v605_v39 }
 0x121   : > { %1056 = vmatprep.subr.bf16.mxu1 %v1055_v53  ;;  %v1067_v53 = vpack.c.bf16 %v596_v51, %v594_v50  ;;  %v609_v50 = vld [vmem:[#allocation8 + $0x1e0] sm:$0xff] }
 0x122   : > { %1118 = vmatpush1.bf16.msra.mxu0 %v1117_v52  ;;  %v658_v52 = vld [vmem:[#allocation8 + $0x368] sm:$0xff] }
 0x123   : > { %1120 = vmatprep.subr.bf16.mxu0 %v1119_v57  ;;  %v1131_v57 = vpack.c.bf16 %v660_v54, %v658_v52  ;;  %v611_v52 = vld [vmem:[#allocation8 + $0x1f0] sm:$0xff] }
 0x124   : > { %1058 = vmatpush1.bf16.msra.mxu1 %v1057_v63  ;;  %v598_v63 = vld [vmem:[#allocation8 + $0x188] sm:$0xff]  ;;  %v675_v54 = vld [vmem:[#allocation8 + $0x3f0] sm:$0xff]  ;;  %v1085_v55 = vpack.c.bf16 %v611_v52, %v609_v50 }
 0x125   : > { %1060 = vmatprep.subr.bf16.mxu1 %v1059_v1  ;;  %v662_v1 = vld [vmem:[#allocation8 + $0x388] sm:$0xff] }
 0x126   : > { %1122 = vmatpush1.bf16.msra.mxu0 %v1121_v0  ;;  %v600_v0 = vld [vmem:[#allocation8 + $0x198] sm:$0xff] }
 0x127   : > { %1124 = vmatprep.subr.bf16.mxu0 %v1123_v2  ;;  %v1071_v2 = vpack.c.bf16 %v600_v0, %v598_v63 }
 0x128   : > { %1062 = vmatpush1.bf16.msra.mxu1 %v1061_v35  ;;  %v670_v35 = vld [vmem:[#allocation8 + $0x3c8] sm:$0xff] }
 0x129   : > { %1064 = vmatprep.subr.bf16.mxu1 %v1063_v41  ;;  %v1143_v38 = vpack.c.bf16 %v672_v36, %v670_v35  ;;  %v669_v41 = vld [vmem:[#allocation8 + $0x3c0] sm:$0xff] }
 0x12a   : > { %1126 = vmatpush1.bf16.msra.mxu0 %v1125_v37 }
 0x12b   : > { %1128 = vmatprep.subr.bf16.mxu0 %v1127_v45  ;;  %v612_v45 = vld [vmem:[#allocation8 + $0x1f8] sm:$0xff] }
 0x12c   : > { %1066 = vmatpush1.bf16.msra.mxu1 %v1065_v46  ;;  %v1145_v46 = vpack.c.bf16 %v671_v43, %v669_v41  ;;  %v1083_v47 = vpack.c.bf16 %v612_v45, %v610_v44  ;;  %v678_v44 = vstv %s677_s28 }
 0x12d   : > { %1068 = vmatprep.subr.bf16.mxu1 %v1067_v53  ;;  %v673_v53 = vld [vmem:[#allocation8 + $0x3e0] sm:$0xff] }
 0x12e   : > { %1130 = vmatpush1.bf16.msra.mxu0 %v1129_v49  ;;  %v676_v49 = vld [vmem:[#allocation8 + $0x3f8] sm:$0xff]  ;;  %v1149_v56 = vpack.c.bf16 %v675_v54, %v673_v53 }
 0x12f   : > { %1132 = vmatprep.subr.bf16.mxu0 %v1131_v57  ;;  %v1147_v51 = vpack.c.bf16 %v676_v49, %v674_v48 }
 0x130   : > { %1070 = vmatpush1.bf16.msra.mxu1 %v1069_v58 }
 0x131   : > { %1072 = vmatprep.subr.bf16.mxu1 %v1071_v2 }
 0x132   : > { %1134 = vmatpush1.bf16.msra.mxu0 %v1133_v62 }
 0x19e   : > { %v462_v13 = vpop.xlane.xlu1 %461  ;;  %v442_v14 = vpop.xlane.xlu0 %441 }
 0x19f   : > { %v465_v15 = vadd.f32 %v464_v7, %v462_v13  ;;  %v445_v16 = vadd.f32 %v444_v12, %v442_v14  ;;  %v664_v7 = vld [vmem:[#allocation8 + $0x398] sm:$0xff]  ;;  %v597_v12 = vld [vmem:[#allocation8 + $0x180] sm:$0xff]  ;;  %v599_v13 = vld [vmem:[#allocation8 + $0x190] sm:$0xff] }
 0x1a1   : > { %v466_v18 = vmax.f32 %v465_v15, 0.0  ;;  %v446_v19 = vmax.f32 %v445_v16, 0.0  ;;  %v1135_v15 = vpack.c.bf16 %v664_v7, %v662_v1  ;;  %v1073_v16 = vpack.c.bf16 %v599_v13, %v597_v12 }
 0x1a3   : > { %v452_v22 = vmul.f32 %v1001_v17, %v446_v19  ;;  %v472_v24 = vmul.f32 %v1004_v20, %v466_v18  ;;  %v661_v17 = vld [vmem:[#allocation8 + $0x380] sm:$0xff]  ;;  %v663_v18 = vld [vmem:[#allocation8 + $0x390] sm:$0xff]  ;;  %1136 = vmatprep.subr.bf16.mxu0 %v1135_v15  ;;  %1074 = vmatpush1.bf16.msra.mxu1 %v1073_v16  ;;  %v602_v20 = vld [vmem:[#allocation8 + $0x1a8] sm:$0xff] }
 0x1a4   : > { %v1137_v19 = vpack.c.bf16 %v663_v18, %v661_v17 }
 0x1a5   : > { %v453_v25 = vadd.f32 %v999_v21, %v452_v22  ;;  %v604_v21 = vld [vmem:[#allocation8 + $0x1b8] sm:$0xff]  ;;  %v666_v22 = vld [vmem:[#allocation8 + $0x3a8] sm:$0xff] }
 0x1a6   : > { %1138 = vmatpush1.bf16.msra.mxu0 %v1137_v19 }
 0x1a7   : > { %v473_v26 = vadd.f32 %v472_v24, %v453_v25  ;;  %v1075_v24 = vpack.c.bf16 %v604_v21, %v602_v20  ;;  %v668_v25 = vld [vmem:[#allocation8 + $0x3b8] sm:$0xff] }
 0x1a9   : > { %v475_v27 = vrot.slane %v473_v26, 1  ;;  %1076 = vmatprep.subr.bf16.mxu1 %v1075_v24 }
 0x1ab   : > { %v477_v28 = vadd.f32 %v475_v27, %v473_v26  ;;  %v601_v26 = vld [vmem:[#allocation8 + $0x1a0] sm:$0xff]  ;;  %v603_v27 = vld [vmem:[#allocation8 + $0x1b0] sm:$0xff] }
 0x1ad   : > { %v1005_v29 = vmul.f32 -1.442695, %v477_v28  ;;  %v1139_v28 = vpack.c.bf16 %v668_v25, %v666_v22 }
 0x1af   : > { %1228 = vpow2.f32 %v1005_v29  ;;  %v1077_v29 = vpack.c.bf16 %v603_v27, %v601_v26  ;;  %1140 = vmatprep.subr.bf16.mxu0 %v1139_v28 }
 0x1b1   : > { %1078 = vmatpush1.bf16.msra.mxu1 %v1077_v29 }
 0x1b9   : > { %v1229_v30 = vpop.eup %1228 }
 0x1ba   : > { %v481_v34 = vadd.f32 1.0, %v1229_v30  ;;  %v665_v30 = vld [vmem:[#allocation8 + $0x3a0] sm:$0xff] }
 0x1bb   : > { %v1141_v33 = vpack.c.bf16 %v667_v31, %v665_v30 }
 0x1bc   : > { %1230 = vrcp.f32 %v481_v34  ;;  %v608_v34 = vld [vmem:[#allocation8 + $0x1d8] sm:$0xff] }
 0x1bd   : > { %v1079_v37 = vpack.c.bf16 %v608_v34, %v606_v32  ;;  %1142 = vmatpush1.bf16.msra.mxu0 %v1141_v33 }
 0x1be   : > { %1144 = vmatprep.subr.bf16.mxu0 %v1143_v38 }
 0x1bf   : > { %1080 = vmatprep.subr.bf16.mxu1 %v1079_v37 }
 0x1c0   : > { %1082 = vmatpush1.bf16.msra.mxu1 %v1081_v42 }
 0x1c1   : > { %1084 = vmatprep.subr.bf16.mxu1 %v1083_v47  ;;  %1146 = vmatpush1.bf16.msra.mxu0 %v1145_v46 }
 0x1c2   : > { %1148 = vmatprep.subr.bf16.mxu0 %v1147_v51 }
 0x1c4   : > { %1086 = vmatpush1.bf16.msra.mxu1 %v1085_v55 }
 0x1c5   : > { %1150 = vmatpush1.bf16.msra.mxu0 %v1149_v56 }
 0x1c6   : > { %v1231_v14 = vpop.eup %1230 }
 0x1c7   : > { %v487_v23 = vrot.slane %v1231_v14, %v1673_v61 }
 0x1c9   : > { %493 = vbcast.lane.b32.xlu1 %v487_v23, 264  ;;  %489 = vbcast.lane.b32.xlu0 %v487_v23, 256 }
 0x1cd   : > { %497 = vbcast.lane.b32.xlu1 %v487_v23, 272 }
 0x1d1   : > { %501 = vbcast.lane.b32.xlu1 %v487_v23, 280 }
 0x23b   : > { %v494_v57 = vpop.permute.xlu1 %493  ;;  %v490_v58 = vpop.permute.xlu0 %489 }
 0x23c   : > { %v1677_v59 = vmul.f32 %v494_v57, %v1629_v10  ;;  %v1680_v60 = vmul.f32 %v494_v57, %v1631_v11  ;;  %v1683_v62 = vmul.f32 %v490_v58, %v1621_v5  ;;  %v1686_v63 = vmul.f32 %v490_v58, %v1623_v6 }
 0x23e   : > { %v511_v10 = vadd.f32 %v1677_v59, %v1683_v62  ;;  %v520_v11 = vadd.f32 %v1680_v60, %v1686_v63 }
 0x23f   : > { %v498_v0 = vpop.permute.xlu1 %497 }
 0x240   : > { %v1689_v1 = vmul.f32 %v498_v0, %v1617_v3  ;;  %v1692_v2 = vmul.f32 %v498_v0, %v1619_v4 }
 0x242   : > { %v512_v5 = vadd.f32 %v511_v10, %v1689_v1  ;;  %v521_v12 = vadd.f32 %v520_v11, %v1692_v2  ;;  %v531_v4 = vmax.f32 %v1683_v62, %v1689_v1  ;;  %v540_v13 = vmax.f32 %v1686_v63, %v1692_v2 }
 0x243   : > { %v502_v7 = vpop.permute.xlu1 %501 }
 0x244   : > { %v1701_v6 = vmul.f32 %v502_v7, %v1625_v8  ;;  %v1704_v3 = vmul.f32 %v502_v7, %v1627_v9 }
 0x246   : > { %v513_v14 = vadd.f32 %v512_v5, %v1701_v6  ;;  %v522_v15 = vadd.f32 %v521_v12, %v1704_v3  ;;  %v532_v16 = vmax.f32 %v1677_v59, %v1701_v6  ;;  %v541_v8 = vmax.f32 %v1680_v60, %v1704_v3 }
 0x248   : > { %v514_v17 = vrot.slane %v513_v14, 4  ;;  %v533_v18 = vmax.f32 %v531_v4, %v532_v16  ;;  %v523_v9 = vrot.slane %v522_v15, 4  ;;  %v542_v23 = vmax.f32 %v540_v13, %v541_v8 }
 0x24a   : > { %v515_v19 = vadd.f32 %v514_v17, %v513_v14  ;;  %v534_v20 = vrot.slane %v533_v18, 4  ;;  %v524_v21 = vadd.f32 %v523_v9, %v522_v15  ;;  %v543_v22 = vrot.slane %v542_v23, 4 }
 0x24c   : > { %v525_v24 = vrot.slane %v524_v21, 2  ;;  %v544_v25 = vmax.f32 %v542_v23, %v543_v22  ;;  %v516_v26 = vrot.slane %v515_v19, 2  ;;  %v535_v27 = vmax.f32 %v533_v18, %v534_v20 }
 0x24e   : > { %v526_v28 = vadd.f32 %v525_v24, %v524_v21  ;;  %v545_v29 = vrot.slane %v544_v25, 2  ;;  %v517_v30 = vadd.f32 %v516_v26, %v515_v19  ;;  %v536_v31 = vrot.slane %v535_v27, 2 }
 0x250   : > { %v527_v32 = vrot.slane %v526_v28, 1  ;;  %v546_v33 = vmax.f32 %v544_v25, %v545_v29  ;;  %v518_v34 = vrot.slane %v517_v30, 1  ;;  %v537_v35 = vmax.f32 %v535_v27, %v536_v31 }
 0x252   : > { %v528_v36 = vadd.f32 %v527_v32, %v526_v28  ;;  %v547_v37 = vrot.slane %v546_v33, 1  ;;  %v519_v38 = vadd.f32 %v518_v34, %v517_v30  ;;  %v538_v39 = vrot.slane %v537_v35, 1 }
 0x254   : > { %v530_v40 = vmul.f32 0.03125, %v528_v36  ;;  %v548_v41 = vmax.f32 %v546_v33, %v547_v37  ;;  %v529_v42 = vmul.f32 0.03125, %v519_v38  ;;  %v539_v43 = vmax.f32 %v537_v35, %v538_v39 }
 0x256   : > { %743 = vmatprep.mubr.f32.mxu1 %v530_v40  ;;  %814 = vmatprep.mubr.f32.mxu0 %v548_v41 }
 0x257   : > { %744 = vmatmul.mubr.f32.vlgmr.msra.gmra.mrb[0].mxu1 %v529_v42  ;;  %815 = vmatmul.mubr.f32.vlgmr.msra.gmra.mrb[0].mxu0 %v539_v43 }
 0x32a   : > { %v745_v45 = vpop.f32.mrb[0].mxu1  ;;  %v816_v46 = vpop.f32.mrb[0].mxu0 }
 0x32b   : > { %v746_v47 = vadd.f32 %v745_v45, %v678_v44  ;;  %v747_v48 = vpop.f32.mrb[1].mxu1  ;;  %v818_v49 = vpop.f32.mrb[1].mxu0 }
 0x32c   : > { %v748_v50 = vadd.f32 %v747_v48, %v678_v44 }
 0x32d   : > { %v817_v51 = vadd.f32 %v816_v46, %v746_v47 }
 0x32e   : > { %v819_v52 = vadd.f32 %v818_v49, %v748_v50 }
 0x32f   : > { %v1006_v53 = vmul.f32 -1.442695, %v817_v51 }
 0x330   : > { %v1007_v54 = vmul.f32 -1.442695, %v819_v52 }
 0x331   : > { %1232 = vpow2.f32 %v1006_v53 }
 0x332   : > { %1234 = vpow2.f32 %v1007_v54 }
 0x33b   : > { %v1233_v55 = vpop.eup %1232 }
 0x33c   : > { %v1235_v56 = vpop.eup %1234  ;;  %v827_v57 = vadd.f32 1.0, %v1233_v55 }
 0x33d   : > { %v828_v58 = vadd.f32 1.0, %v1235_v56 }
 0x33e   : > { %1236 = vrcp.f32 %v827_v57 }
 0x33f   : > { %1238 = vrcp.f32 %v828_v58 }
 0x348   : > { %v1237_v0 = vpop.eup %1236 }
 0x349   : > { %v1239_v10 = vpop.eup %1238  ;;  %v836_v11 = vrot.slane %v1237_v0, %v1673_v61 }
 0x34a   : > { %v840_v7 = vrot.slane %v1239_v10, %v1673_v61 }
 0x34b   : > { %v841_v5 = vmul.f32 %v836_v11, %v1683_v62  ;;  %v843_v12 = vmul.f32 %v836_v11, %v1677_v59  ;;  %v845_v4 = vmul.f32 %v836_v11, %v1689_v1  ;;  %v847_v13 = vmul.f32 %v836_v11, %v1701_v6 }
 0x34c   : > { %v842_v14 = vmul.f32 %v840_v7, %v1686_v63  ;;  %v844_v15 = vmul.f32 %v840_v7, %v1680_v60  ;;  %v846_v61 = vmul.f32 %v840_v7, %v1692_v2  ;;  %v848_v16 = vmul.f32 %v840_v7, %v1704_v3 }
 0x34e   : > { %v1018_v59 = vpack.c.bf16 %v842_v14, %v841_v5  ;;  %v1019_v62 = vpack.c.bf16 %v844_v15, %v843_v12  ;;  %v1020_v63 = vpack.c.bf16 %v846_v61, %v845_v4  ;;  %v1021_v1 = vpack.c.bf16 %v848_v16, %v847_v13 }
 0x350   : > { %873 = vst [vmem:[%s326_s25] sm:$0xff] %v1018_v59  ;;  %874 = vst [vmem:[%s326_s25 + $0x8] sm:$0xff] %v1019_v62 }
 0x351   : > { %875 = vst [vmem:[%s326_s25 + $0x10] sm:$0xff] %v1020_v63  ;;  %876 = vst [vmem:[%s326_s25 + $0x18] sm:$0xff] %v1021_v1 }
 0x352   : > { %1326 = shalt.err (!%p1323_p0)
}
 0x353   : > { %s1327_s10 = scalar_lea.hbm %s1732_s11, 512  ;;  %s1331_s30 = scalar_lea.hbm %s1785_s7, 1024 }
 0x354   : > { %p1328_p2 = scmp.ne.s32.totalorder %s1732_s11, %s1327_s10  ;;  %p1332_p13 = scmp.lt.u32.totalorder %s1732_s11, %s1785_s7 }
 0x355   : > { %p1333_p12 = scmp.lt.u32.totalorder %s1331_s30, %s1327_s10  ;;  %p1335_p10 = scmp.lt.u32.totalorder %s1327_s10, %s1732_s11 }
 0x356   : > { %p1329_p7 = pnand %p1328_p2, %p1806_p1 }
 0x357   : > { %p1334_p8 = por %p1333_p12, %p1332_p13 }
 0x358   : > { %p1330_p3 = pneg %p1329_p7 }
 0x359   : > { %p1336_p5 = por %p1335_p10, %p1334_p8 }
 0x35b   : > { %p1337_p4 = pnand %p1336_p5, %p1330_p3 }
 0x35d   : > { %1340 = shalt.err (!%p1337_p4)
}
 0x35e   : > { %s1397_s28 = smov 128   ;;  %s1398_s22 = smov 8  }
 0x35f   : > { %1165 = dma.vmem_to_hbm [thread:$0]  (%p1806_p1), %s1734_s9, 512, %s1732_s11, %s878_s13, %s1397_s28, %s1397_s28, %s1398_s22  }
 0x360 PF: > { %s906_s25 = sand.u32 1, %s1375_s26   ;;  %p1807_p6 = scmp.ne.s32.totalorder %s1796_s15, 0 }
 0x361   : > { %p1808_p9 = scmp.ge.s32.totalorder %s1387_s29, 2  ;;  %s907_s6 = scalar_lea.sflag [#allocation5], %s906_s25 }
 0x363   : > { %p1179_p11 = pnand %p1808_p9, %p1807_p6 }
 0x365   : > { %1370 = dma.done.wait (!%p1179_p11), %s907_s6, 512  }
 0x366   : > { %1372 = vsyncadd (!%p1179_p11), %s907_s6, 4294966784  ;;  %s1809_s23 = sld [smem:[#allocation15_spill]]  ;;  %s1810_s28 = sld [smem:[#allocation16_spill]] }
 0x367   : > { %p23_p0 = scmp.ge.s32.totalorder %s1467_s8, 4   ;;  %s1811_s26 = smov %s1379_s27 }
 0x368   : > { %s1813_s29 = smov %s1467_s8 }
 0x369   :  { %25 = sbr.rel (!%p23_p0) target bundleno = 10 (0xa), region = 102 }
 0x36c   : > { %s1812_s27 = smov %s1809_s23 }
 0x370   :  { %912 = vsyncpa [#allocation4], 1 }
 0x371   :  { %914 = vsyncpa [#allocation4 + $0x1], 1 }
 0x372   :  { %915 = vsyncpa [#allocation9], 1 }
 0x373   :  { %916 = vsyncpa [#allocation5], 1 }
 0x374   :  { %918 = vsyncpa [#allocation5 + $0x1], 1 }
 0x375   :  { %919 = vsyncpa [#allocation6], 1 }
 0x376   :  { %921 = vsyncpa [#allocation6 + $0x1], 1 }

</bundles_post_ra>
